<compile_context>
chip_gen: v6e
topology: v6e:2x2x1
jax: 0.10.0
libtpu: 0.0.40
codegen_flags: <defaults>
</compile_context>

<pallas_src>
import math

import jax
import jax.numpy as jnp
from jax.experimental import pallas as pl
from jax.experimental.pallas import tpu as pltpu


def _pe_add_kernel(x_ref, pe_ref, o_ref):
    # x_ref : (block_b, block_n)  lane-dense slab of the flattened (B, S*D) input
    # pe_ref: (1, block_n)        matching slice of the PE row, broadcast over rows
    # o_ref : (block_b, block_n)
    o_ref[...] = x_ref[...] + pe_ref[...]


def _vmem_capacity_bytes():
    try:
        return int(pltpu.get_tpu_info().vmem_capacity_bytes)
    except Exception:
        return 64 << 20  # conservative fallback (v7x per-core VMEM)


def _choose_blocks(b, n, itemsize, budget_bytes):
    """Pick (block_b, block_n) such that one block fits budget_bytes, blocks are
    (sublane-pack, 128)-aligned (or equal the full dim), and the grid has >= 2
    steps whenever possible (v7x megacore + DMA/compute overlap)."""
    sublane = max(8, 32 // itemsize)      # 8 for f32, 16 for bf16/f16, 32 for int8/fp8
    row_bytes = n * itemsize

    rows_in_budget = budget_bytes // max(1, row_bytes)
    if rows_in_budget >= min(b, sublane):
        # Full-width rows fit the budget: tile the batch axis only.
        block_n = n
        if rows_in_budget >= b:
            block_b = b
        else:
            block_b = max(sublane, (rows_in_budget // sublane) * sublane)
            block_b = min(block_b, b)
    else:
        # Even a sublane-pack of full rows blows the budget: tile the lane axis too.
        block_b = b if b < sublane else sublane
        if n % 128 == 0:
            lanes = budget_bytes // max(1, block_b * itemsize)
            block_n = min(n, max(128, (lanes // 128) * 128))
        else:
            # TODO(synk): flattened N not 128-aligned; keep full rows (may exceed budget).
            block_n = n

    # Guarantee at least 2 grid steps (v7x has 2 TensorCores; also enables
    # input/compute/output overlap on v5e/v6e).
    grid_b = -(-b // block_b)
    grid_n = -(-n // block_n)
    if grid_b * grid_n < 2:
        if b >= 2 * sublane:
            block_b = max(sublane, ((b // 2) // sublane) * sublane)
        elif block_n == n and n % 256 == 0:
            block_n = n // 2  # still a multiple of 128
    return block_b, block_n


def pallas_positional_encoding_add(x, pe2d, seq_len, d_model):
    """x + pe with pe broadcast over the leading dims of x.

    pe2d must be the flattened (1, seq_len*d_model) table.
    """
    if x.shape[-2:] != (seq_len, d_model):
        raise ValueError(f"x trailing dims {x.shape[-2:]} != pe shape {(seq_len, d_model)}")
    if pe2d.dtype != x.dtype:
        pe2d = pe2d.astype(x.dtype)

    orig_shape = x.shape
    lead = x.shape[:-2]
    b = int(math.prod(lead)) if lead else 1
    n = seq_len * d_model
    itemsize = jnp.dtype(x.dtype).itemsize

    # Generation-aware block budget: ~1/12 of physical VMEM per block so that the
    # double-buffered (2x in + 2x out + pe) footprint stays comfortably inside
    # 64 MiB on every generation (v5e/v6e 128 MiB, v7x 64 MiB).
    vmem_cap = _vmem_capacity_bytes()
    budget = max(2 << 20, min(12 << 20, vmem_cap // 12))

    block_b, block_n = _choose_blocks(b, n, itemsize, budget)
    grid = (-(-b // block_b), -(-n // block_n))

    # Free reshapes: same contiguous HBM layout, metadata only.
    x2d = x.reshape(b, n)

    cost = pl.CostEstimate(
        flops=b * n,
        transcendentals=0,
        bytes_accessed=2 * b * n * itemsize + n * itemsize,
    )

    out2d = pl.pallas_call(
        _pe_add_kernel,
        out_shape=jax.ShapeDtypeStruct((b, n), x.dtype),
        grid=grid,
        in_specs=[
            pl.BlockSpec((block_b, block_n), lambda i, j: (i, j)),
            pl.BlockSpec((1, block_n), lambda i, j: (0, j)),  # same pe row, tiled lanes
        ],
        out_specs=pl.BlockSpec((block_b, block_n), lambda i, j: (i, j)),
        input_output_aliases={0: 0},  # elementwise; reuse x's buffer for the output
        compiler_params=pltpu.CompilerParams(
            dimension_semantics=("parallel", "parallel"),
            vmem_limit_bytes=64 << 20,
        ),
        cost_estimate=cost,
    )(x2d, pe2d)

    return out2d.reshape(orig_shape)


class PositionalEncoding:
    """JAX/Pallas mirror of the PyTorch PositionalEncoding module."""

    def __init__(self, d_model, seq_len, dtype=jnp.float32):
        # Buffer init (register_buffer equivalent): plain jnp, computed once.
        position = jnp.arange(seq_len, dtype=jnp.float32)[:, None]                 # (S, 1)
        div_term = jnp.power(
            10000.0, jnp.arange(0, d_model, 2, dtype=jnp.float32) / d_model
        )                                                                           # (ceil(D/2),)
        angles = position / div_term                                                # (S, ceil(D/2))
        pe = jnp.zeros((seq_len, d_model), dtype=jnp.float32)
        pe = pe.at[:, 0::2].set(jnp.sin(angles))
        pe = pe.at[:, 1::2].set(jnp.cos(angles)[:, : d_model // 2])  # robust to odd d_model
        self.pe = pe.astype(dtype)
        # Hoisted out of the hot path: pre-flattened (and pre-cast) PE row.
        self._pe2d = self.pe.reshape(1, seq_len * d_model)
        self.d_model = d_model
        self.seq_len = seq_len

    def __call__(self, x):
        pe2d = self._pe2d if self._pe2d.dtype == x.dtype else self._pe2d.astype(x.dtype)
        return pallas_positional_encoding_add(x, pe2d, self.seq_len, self.d_model)


if __name__ == "__main__":
    key = jax.random.PRNGKey(0)
    batch, seq_len, d_model = 2, 8, 32
    x = jax.random.normal(key, (batch, seq_len, d_model), dtype=jnp.float32)

    mod = PositionalEncoding(d_model, seq_len)
    ref = x + mod.pe  # broadcast reference (same semantics as torch x + self.pe)

    y = jax.block_until_ready(mod(x))

    assert y.shape == ref.shape and y.dtype == ref.dtype
    assert jnp.allclose(y, ref, atol=1e-6, rtol=1e-6), "Pallas PE mismatch vs reference"

    print("KERNEL_OK")
</pallas_src>

<mosaic_0001>
module attributes {stable_mosaic.version = 11 : i64} {
  func.func @_pe_add_kernel(%arg0: i32, %arg1: i32, %arg2: memref<2x128xf32, #tpu.memory_space<vmem>>, %arg3: memref<1x128xf32, #tpu.memory_space<vmem>>, %arg4: memref<2x128xf32, #tpu.memory_space<vmem>>) attributes {dimension_semantics = [#tpu.dimension_semantics<parallel>, #tpu.dimension_semantics<parallel>], iteration_bounds = array<i64: 1, 2>, scalar_prefetch = 0 : i64, scratch_operands = 0 : i64, tpu.core_type = #tpu.core_type<tc>, window_params = [{transform_indices = @transform_0, window_bounds = array<i64: 2, 128>}, {transform_indices = @transform_1, window_bounds = array<i64: 1, 128>}, {transform_indices = @transform_2, window_bounds = array<i64: 2, 128>}]} {
    %c0 = arith.constant 0 : index
    %c0_0 = arith.constant 0 : index
    %0 = vector.load %arg2[%c0, %c0_0] : memref<2x128xf32, #tpu.memory_space<vmem>>, vector<2x128xf32>
    %c0_1 = arith.constant 0 : index
    %c0_2 = arith.constant 0 : index
    %1 = vector.load %arg3[%c0_1, %c0_2] : memref<1x128xf32, #tpu.memory_space<vmem>>, vector<1x128xf32>
    %2 = vector.broadcast %1 : vector<1x128xf32> to vector<2x128xf32>
    %3 = arith.addf %0, %2 : vector<2x128xf32>
    %c0_3 = arith.constant 0 : index
    %c0_4 = arith.constant 0 : index
    %4 = vector.load %arg4[%c0_3, %c0_4] : memref<2x128xf32, #tpu.memory_space<vmem>>, vector<2x128xf32>
    tpu.vector_store %arg4[%c0_3, %c0_4], %3 {strides = array<i32>} : memref<2x128xf32, #tpu.memory_space<vmem>>, vector<2x128xf32>,
    return
  }
  func.func @transform_0(%arg0: i32, %arg1: i32) -> (i32, i32) {
    %c0_i32 = arith.constant 0 : i32
    return %arg0, %arg1 : i32, i32
  }
  func.func @transform_1(%arg0: i32, %arg1: i32) -> (i32, i32) {
    %c0_i32 = arith.constant 0 : i32
    %c0_i32_0 = arith.constant 0 : i32
    return %c0_i32, %arg1 : i32, i32
  }
  func.func @transform_2(%arg0: i32, %arg1: i32) -> (i32, i32) {
    %c0_i32 = arith.constant 0 : i32
    return %arg0, %arg1 : i32, i32
  }
}

</mosaic_0001>

<bundles_post_ra>
// kernel: tpu_custom_call.1
= control target key start
LH: loop header
LB: loop body
LE: loop exit
PB: predicated region body
PF: predicated region fallthrough
CT: control target
= control target key end

     0   :  { %7 = vsyncpa [#allocation3], 0  ;;  %s650_s0 = inlined_call_operand.hbm [shape: f32[2,256], index: 0, kind: input, shape index: {}, may-alias: {0,2}]   ;;  %s651_s1 = inlined_call_operand.vmem [shape: f32[1,256], index: 1, kind: input, shape index: {}]   ;;  %s652_s2 = inlined_call_operand.hbm [shape: f32[2,256], index: 2, kind: output, shape index: {}, may-alias: {0,2}]  }
   0x1   :  { %9 = vsyncpa [#allocation3 + $0x1], 0 }
   0x2   :  { %10 = vsyncpa [#allocation4], 0 }
   0x3   :  { %12 = vsyncpa [#allocation4 + $0x1], 0  ;;  %s511_s9 = smov 0   ;;  %s513_s10 = smov 0  }
   0x4   :  { %s515_s11 = smov 0   ;;  %s517_s12 = smov 0  }
   0x5   :  { %s519_s13 = smov 0   ;;  %s521_s14 = smov 0  }
   0x6 LB: > { %s308_s15 = sadd.s32 4294967295, %s492_s14   ;;  %s309_s16 = sadd.s32 4294967294, %s492_s14   ;;  %s492_s14 = sphi %s521_s14, %s18_s14   ;;  %s488_s13 = sphi %s519_s13, %s664_s13   ;;  %s484_s12 = sphi %s517_s12, %s663_s12   ;;  %s480_s11 = sphi %s515_s11, %s662_s11   ;;  %s476_s10 = sphi %s513_s10, %s661_s10   ;;  %s472_s9 = sphi %s511_s9, %s660_s9  }
   0x7   : > { %s27_s17 = sadd.s32 1, %s488_s13  ;;  %s39_s18 = sadd.s32 1, %s480_s11 }
   0x8   : > { %p28_p0 = scmp.ge.s32.totalorder %s27_s17, 2  ;;  %p46_p1 = scmp.ne.s32.totalorder %s480_s11, %s476_s10 }
   0x9   : > { %p47_p2 = scmp.eq.s32.totalorder %s492_s14, 0  ;;  %p52_p3 = scmp.ne.s32.totalorder %s476_s10, %s472_s9 }
   0xa   : > { %s666_s17 = smov (%p28_p0, %s27_s17), 0  ;;  %p53_p5 = scmp.eq.s32.totalorder %s308_s15, 0 }
   0xb   : > { %p552_p4 = por %p47_p2, %p46_p1  ;;  %s35_s20 = ssub.s32 %s488_s13, %s666_s17 }
   0xc   : > { %p104_p6 = scmp.eq.s32.totalorder %s308_s15, 1  ;;  %p37_p7 = scmp.eq.s32.totalorder %s35_s20, 0 }
   0xd   : > { %p558_p8 = por %p53_p5, %p52_p3  ;;  %p110_p10 = scmp.eq.s32.totalorder %s309_s16, 1 }
   0xe   : > { %p562_p9 = por %p104_p6, %p46_p1  ;;  %p334_p13 = scmp.lt.s32.totalorder %s492_s14, 2 }
   0xf   : > { %s567_s23 = scalar_select %p37_p7, %s480_s11, %s39_s18  }
  0x10   : > { %p569_p11 = por %p110_p10, %p52_p3  ;;  %s130_s25 = sand.u32 1, %s480_s11  }
  0x11   : > { %s312_s26 = sshll.u32 %s130_s25, 1  ;;  %s313_s27 = sshll.u32 %s488_s13, 5 }
  0x12   : > { %s656_s24 = scalar_select %p569_p11, 1, 0 }
  0x13   : > { %s141_s30 = scalar_lea.hbm %s650_s0, %s313_s27  ;;  %s134_s3 = scalar_lea.vmem [#allocation2], %s312_s26 }
  0x14   : > { %s143_s4 = sshll.u32 %s134_s3, 4  ;;  %p582_p0 = pnand %p334_p13, %p552_p4  ;;  %s144_s4 = int_to_ptr.vmem [resolvable:$true] %s143_s4 }
  0x15   : > { %p314_p1 = scmp.ge.s32.totalorder %s492_s14, 1  ;;  %p154_p2 = scmp.lt.s32.totalorder %s492_s14, 3 }
  0x16   : > { %s131_s6 = scalar_lea.sflag [#allocation3], %s130_s25  ;;  %p386_p3 = pneg %p582_p0 }
  0x17   : > { %s397_s7 = scalar_lea.vmem %s144_s4, 32  ;;  %s494_s8 = smov [#allocation2]  }
  0x18   : > { %p398_p5 = scmp.ne.s32.totalorder %s144_s4, %s397_s7  ;;  %s402_s15 = sshll.u32 %s494_s8, 4  ;;  %s403_s15 = int_to_ptr.vmem [resolvable:$false] %s402_s15 }
  0x19   : > { %s404_s16 = scalar_lea.vmem %s403_s15, 64  ;;  %p405_p10 = scmp.lt.s32.totalorder %s144_s4, %s403_s15 }
  0x1a   : > { %p400_p6 = pnand %p398_p5, %p386_p3  ;;  %p406_p12 = scmp.lt.s32.totalorder %s404_s16, %s397_s7 }
  0x1c   : > { %p401_p7 = pneg %p400_p6  ;;  %p407_p4 = por %p406_p12, %p405_p10 }
  0x1e   : > { %p408_p13 = pnand %p407_p4, %p401_p7 }
  0x20   : > { %411 = shalt.err (!%p408_p13)
}
  0x21   : > { %329 = dma.hbm_to_vmem [thread:$0]  (!%p582_p0), %s141_s30, 32, %s144_s4, %s131_s6  }
  0x22   : > { %p155_p11 = pnand %p314_p1, %p154_p2 }
  0x23   : > { %s597_s18 = sand.u32 (!%p155_p11), 1, %s476_s10  }
  0x24   : > { %158 = sbr.rel (%p155_p11) target bundleno = 68 (0x44), region = 28  ;;  %s315_s19 = sshll.u32 (!%p155_p11), %s597_s18, 1 }
  0x25   : > { %s161_s20 = scalar_lea.sflag (!%p155_p11), [#allocation3], %s597_s18  ;;  %s164_s25 = scalar_lea.vmem (!%p155_p11), [#allocation2], %s315_s19 }
  0x29   : > { %463 = dma.done.wait (%p558_p8), %s161_s20, 32  }
  0x2a   : > { %465 = vsyncadd (%p558_p8), %s161_s20, 4294967264  ;;  %p188_p11 = scmp.lt.s32.totalorder %s484_s12, 1  ;;  %s187_s30 = scalar_lea.vmem [#allocation5], %s315_s19  ;;  %v191_v0 = vld [vmem:[%s164_s25] sm:$0x3] }
  0x2b   : > { %s217_s3 = sshll.u32 %s187_s30, 4  ;;  %s319_s4 = sshll.u32 %s484_s12, 5  ;;  %s218_s3 = int_to_ptr.vmem [resolvable:$true] %s217_s3 }
  0x2c   : > { %s189_s26 = scalar_select %p188_p11, %s484_s12, 1 }
  0x2d   : > { %s215_s6 = scalar_lea.hbm %s652_s2, %s319_s4  ;;  %s202_s7 = scalar_lea.sflag [#allocation4], %s597_s18 }
  0x2e   : > { %s190_s29 = scalar_lea.vmem %s651_s1, %s189_s26  ;;  %s412_s8 = scalar_lea.vmem %s218_s3, 32 }
  0x2f   : > { %v317_v1 = vld [vmem:[%s190_s29] ss:$0 sm:$0xff]  ;;  %p413_p8 = scmp.ne.s32.totalorder %s218_s3, %s412_s8  ;;  %s495_s15 = smov [#allocation5]  }
  0x30   : > { %v199_v2 = vadd.f32 %v317_v1, %v191_v0  ;;  %s416_s16 = sshll.u32 %s495_s15, 4  ;;  %s417_s16 = int_to_ptr.vmem [resolvable:$false] %s416_s16 }
  0x31   : > { %p414_p12 = pnand %p413_p8, %p562_p9  ;;  %s418_s19 = scalar_lea.vmem %s417_s16, 64 }
  0x32   : > { %200 = vst [vmem:[%s187_s30] sm:$0x3] %v199_v2  ;;  %p419_p1 = scmp.lt.s32.totalorder %s218_s3, %s417_s16  ;;  %p420_p2 = scmp.lt.s32.totalorder %s418_s19, %s412_s8 }
  0x33   : > { %p415_p0 = pneg %p414_p12 }
  0x34   : > { %p421_p3 = por %p420_p2, %p419_p1 }
  0x36   : > { %p422_p5 = pnand %p421_p3, %p415_p0 }
  0x38   : > { %425 = shalt.err (!%p422_p5)
}
  0x39   : > { %s426_s12 = scalar_lea.hbm %s215_s6, 32  ;;  %s430_s25 = scalar_lea.hbm %s652_s2, 64 }
  0x3a   : > { %p427_p6 = scmp.ne.s32.totalorder %s215_s6, %s426_s12  ;;  %p431_p4 = scmp.lt.s32.totalorder %s215_s6, %s652_s2 }
  0x3b   : > { %p432_p13 = scmp.lt.s32.totalorder %s430_s25, %s426_s12 }
  0x3c   : > { %p428_p7 = pnand %p427_p6, %p562_p9 }
  0x3d   : > { %p433_p11 = por %p432_p13, %p431_p4 }
  0x3e   : > { %p429_p10 = pneg %p428_p7 }
  0x40   : > { %p434_p8 = pnand %p433_p11, %p429_p10 }
  0x42   : > { %437 = shalt.err (!%p434_p8)
}
  0x43   : > { %324 = dma.vmem_to_hbm [thread:$0]  (%p562_p9), %s218_s3, 32, %s215_s6, %s202_s7  }
  0x44 PF: > { %s229_s28 = sand.u32 1, %s472_s9   ;;  %p658_p12 = scmp.ne.s32.totalorder %s656_s24, 0 }
  0x45   : > { %p659_p0 = scmp.ge.s32.totalorder %s492_s14, 2  ;;  %s230_s29 = scalar_lea.sflag [#allocation4], %s229_s28 }
  0x47   : > { %p331_p1 = pnand %p659_p0, %p658_p12 }
  0x49   : > { %p332_p2 = pneg %p331_p1 }
  0x4b   : > { %467 = dma.done.wait (%p332_p2), %s230_s29, 32  }
  0x4c   : > { %469 = vsyncadd (%p332_p2), %s230_s29, 4294967264  ;;  %s18_s14 = sadd.s32 1, %s492_s14   ;;  %s660_s9 = smov %s476_s10 }
  0x4d   : > { %p15_p3 = scmp.ge.s32.totalorder %s18_s14, 4   ;;  %s661_s10 = smov %s480_s11 }
  0x4e   : > { %s662_s11 = smov %s567_s23  ;;  %s663_s12 = smov %s488_s13 }
  0x4f   : > { %s664_s13 = smov %s666_s17  ;;  %17 = sbr.rel (!%p15_p3) target bundleno = 6 (0x6), region = 76 }
  0x54   :  { %235 = vsyncpa [#allocation3], 1 }
  0x55   :  { %237 = vsyncpa [#allocation3 + $0x1], 1 }
  0x56   :  { %238 = vsyncpa [#allocation4], 1 }
  0x57   :  { %240 = vsyncpa [#allocation4 + $0x1], 1 }

</bundles_post_ra>
